<compile_context>
chip_gen: v7x
topology: tpu7x:2x2x1
jax: 0.10.0
libtpu: 0.0.40
codegen_flags: <defaults>
</compile_context>

<pallas_src>
import functools

import jax
import jax.numpy as jnp
from jax.experimental import pallas as pl
from jax.experimental.pallas import tpu as pltpu


MXU_DTYPE = jnp.bfloat16                  # MXU operand dtype (accumulation stays f32)
_VMEM_TILE_BUDGET = 24 * 1024 * 1024      # per-block activation budget (fits all gens)
_VMEM_LIMIT_BYTES = 48 * 1024 * 1024      # scoped VMEM limit (< v7x 64 MiB physical)


# ----------------------------------------------------------------------------
# Fused Pallas kernel: the whole GaussConvNet on one block of rows
# ----------------------------------------------------------------------------
def _fused_gauss_net_kernel(*refs, num_layers, kernel_size, dilations, W, TBW,
                            mxu_dtype):
    # refs = [x_ref, (w1,b1,w2,b2,wd,bd) * num_layers, out_ref, cols_scratch]
    #   x_ref : (Cin0, TBW)          activations; channels on sublanes, flat
    #                                row-major positions (TB rows * W) on lanes
    #   w*    : (Cout, k*Cin) bf16   im2col-flattened taps (columns grouped by tap)
    #   wd    : (Cout, Cin)   bf16   1x1 downsample
    #   b*    : (Cout, 1)     f32
    #   out   : (CoutL, TBW)
    #   cols  : (k*Cmax, TBW) bf16   VMEM scratch for the stacked taps
    x_ref = refs[0]
    out_ref = refs[1 + 6 * num_layers]
    cols_ref = refs[2 + 6 * num_layers]
    k = kernel_size

    # Within-row position of every flat lane (blocks always start at a row boundary).
    wpos = jax.lax.broadcasted_iota(jnp.int32, (1, TBW), 1) % W

    # One causal mask per distinct shift across the whole net (JAX does not CSE these).
    masks = {}

    def mask_for(s):
        if s not in masks:
            masks[s] = wpos >= s
        return masks[s]

    def roll_lanes(h, s):
        # Logical roll toward higher indices by s (== jnp.roll(h, s, axis=1)).
        if TBW % 128 == 0:
            return pltpu.roll(h, shift=s, axis=1)      # XLU slot, lane-aligned blocks
        # Tiny / unaligned blocks (e.g. unit tests): equivalent slice-based roll.
        return jnp.concatenate([h[:, TBW - s:], h[:, :TBW - s]], axis=1)

    def write_taps(hb, d, cin):
        # Stack the k causally shifted taps along the channel (sublane) axis of
        # the VMEM scratch.  hb is already bf16, so shifting/masking moves half
        # the bytes of the f32 path.  Positions whose within-row index < shift
        # are zeroed -> no leakage across row boundaries (causal left padding).
        for t in range(k):
            s = (k - 1 - t) * d
            if s == 0:
                tap = hb
            elif s >= W:
                tap = jnp.zeros_like(hb)
            else:
                rolled = roll_lanes(hb, s)
                tap = jnp.where(mask_for(s), rolled, jnp.zeros_like(rolled))
            cols_ref[t * cin:(t + 1) * cin, :] = tap

    def causal_conv(hb, w_ref, b_ref, d, cin):
        # conv + chomp as a single MXU matmul with contraction depth k*cin.
        write_taps(hb, d, cin)
        y = jnp.dot(w_ref[...], cols_ref[0:k * cin, :],
                    preferred_element_type=jnp.float32)
        return y + b_ref[...]

    h = x_ref[...].astype(jnp.float32)
    for l in range(num_layers):
        w1, b1, w2, b2, wd, bd = refs[1 + 6 * l: 7 + 6 * l]
        d = dilations[l]
        cin = w1.shape[1] // k
        cout = w1.shape[0]

        hb = h.astype(mxu_dtype)                       # cast once; reused by conv1 + downsample
        h1 = jnp.tanh(causal_conv(hb, w1, b1, d, cin))     # conv1+chomp+tanh (+dropout=id)
        h1b = h1.astype(mxu_dtype)
        h2 = jnp.tanh(causal_conv(h1b, w2, b2, d, cout))   # conv2+chomp+tanh (+dropout=id)
        res = jnp.dot(wd[...], hb,                         # 1x1 downsample residual
                      preferred_element_type=jnp.float32) + bd[...]
        h = jax.nn.relu(h2 + res)

    out_ref[...] = h.astype(out_ref.dtype)


# ----------------------------------------------------------------------------
# Tiling choice
# ----------------------------------------------------------------------------
def _pick_tb_h(H, W, per_lane_bytes, min_tiles=1):
    """Rows (of width W) per grid block along the flattened H*W axis.

    Targets a large lane-dense block (~16-32K flat positions, capped by a
    conservative VMEM budget that fits every generation, incl. v7x's 64 MiB) to
    amortize the ~0.35us per-grid-step overhead.  When H is split, TB*W is kept
    a multiple of 128 so output stores are unmasked vst.  `min_tiles` lets the
    caller request >=2 grid steps (v7x megacore) when the batch axis alone
    would give only one.
    """
    target_lanes = max(512, min(32 * 1024, _VMEM_TILE_BUDGET // max(per_lane_bytes, 1)))
    target_rows = max(1, target_lanes // W)
    if min_tiles > 1:
        target_rows = min(target_rows, max(1, H // min_tiles))
    if H <= target_rows:
        return H
    for d in range(target_rows, 0, -1):
        if H % d == 0 and (d * W) % 128 == 0:
            return d
    # Fallback: whole image per block (a full-extent block is always legal).
    return H


# ----------------------------------------------------------------------------
# Full network forward (single pallas_call)
# ----------------------------------------------------------------------------
def gauss_conv_net_pallas(x_nchw, layers, kernel_size, *, out_dtype=jnp.float32,
                          mxu_dtype=MXU_DTYPE):
    N, Cin, H, Wd = x_nchw.shape
    num_layers = len(layers)
    cout_last = layers[-1]["w1f"].shape[0]
    dilations = tuple(2 ** i for i in range(num_layers))
    k = kernel_size

    # Rough per-flat-position VMEM footprint (double-buffered in/out blocks,
    # live f32 activations, bf16 casts, im2col scratch) -> drives the tile size.
    max_c = max([Cin] + [p["w1f"].shape[0] for p in layers])
    per_lane_bytes = (2 * Cin * 4                                # input block (dbuf, f32)
                      + 2 * cout_last * jnp.dtype(out_dtype).itemsize  # output block (dbuf)
                      + 4 * max_c * 4                            # live f32 activations
                      + 2 * max_c * 2                            # bf16 casts
                      + k * max_c * 2)                           # im2col scratch (bf16)

    min_tiles = 1 if N >= 2 else 2                               # keep both v7x TCs busy
    tb = _pick_tb_h(H, Wd, per_lane_bytes, min_tiles=min_tiles)
    TBW = tb * Wd
    n_wtiles = H // tb

    # FREE reshape: NCHW -> (N, Cin, H*W); the kernel reads native-layout blocks.
    x_flat = x_nchw.reshape(N, Cin, H * Wd)

    kern = functools.partial(
        _fused_gauss_net_kernel, num_layers=num_layers, kernel_size=k,
        dilations=dilations, W=Wd, TBW=TBW, mxu_dtype=mxu_dtype)

    # Resident weights/biases: constant index_map + single-buffered (no point
    # double-buffering data that never changes; the freed VMEM goes to larger
    # activation tiles).
    def resident(shape):
        return pl.BlockSpec(shape, lambda n, i: (0, 0),
                            pipeline_mode=pl.Buffered(buffer_count=1))

    in_specs = [pl.BlockSpec((pl.Squeezed(), Cin, TBW), lambda n, i: (n, 0, i))]
    args = [x_flat]
    for p in layers:
        for name in ("w1f", "b1", "w2f", "b2", "wdf", "bd"):
            a = p[name]
            in_specs.append(resident(a.shape))
            args.append(a)

    cols_rows = k * max_c

    out_flat = pl.pallas_call(
        kern,
        out_shape=jax.ShapeDtypeStruct((N, cout_last, H * Wd), out_dtype),
        grid=(N, n_wtiles),
        in_specs=in_specs,
        out_specs=pl.BlockSpec((pl.Squeezed(), cout_last, TBW),
                               lambda n, i: (n, 0, i)),
        scratch_shapes=[pltpu.VMEM((cols_rows, TBW), mxu_dtype)],
        compiler_params=pltpu.CompilerParams(
            dimension_semantics=("parallel", "parallel"),
            vmem_limit_bytes=_VMEM_LIMIT_BYTES),
    )(*args)

    # FREE reshape back to NCHW.
    return out_flat.reshape(N, cout_last, H, Wd)


# ----------------------------------------------------------------------------
# Parameter init (deterministic, synthetic).  weight_norm effective weight
# w_eff = g * v / ||v||_{per output channel} computed here (host glue).
# ----------------------------------------------------------------------------
def _weight_norm_effective(kv, kg, cout, cin, kw):
    v = 0.01 * jax.random.normal(kv, (cout, cin, 1, kw), jnp.float32)
    g = jax.random.uniform(kg, (cout, 1, 1, 1), jnp.float32, minval=0.5, maxval=1.5)
    nrm = jnp.sqrt(jnp.sum(v * v, axis=(1, 2, 3), keepdims=True))
    return g * v / nrm                            # (Cout, Cin, 1, kw) torch OIHW


def _flat_taps(w_oihw):
    # (Cout, Cin, 1, k) -> (Cout, k*Cin), columns grouped by tap t (matches the
    # in-kernel im2col: tap t occupies scratch rows [t*Cin, (t+1)*Cin)).
    # No padding toward MXU-native sizes: at these channel counts the MXU is far
    # off the critical path (and padding would waste passes on v5e's 128 MXU).
    cout, cin, _, k = w_oihw.shape
    return jnp.transpose(w_oihw[:, :, 0, :], (0, 2, 1)).reshape(cout, k * cin)


def init_gauss_conv_net(key, num_inputs, num_channels, kernel_size,
                        mxu_dtype=MXU_DTYPE):
    layers = []
    in_c = num_inputs
    for out_c in num_channels:
        key, k1, k2, k3, k4, k5, k6, k7, k8 = jax.random.split(key, 9)
        w1_t = _weight_norm_effective(k1, k2, out_c, in_c, kernel_size)
        w2_t = _weight_norm_effective(k3, k4, out_c, out_c, kernel_size)
        wd_t = 0.01 * jax.random.normal(k5, (out_c, in_c, 1, 1), jnp.float32)
        b1 = 0.1 * jax.random.normal(k6, (out_c,), jnp.float32)
        b2 = 0.1 * jax.random.normal(k7, (out_c,), jnp.float32)
        bd = 0.1 * jax.random.normal(k8, (out_c,), jnp.float32)
        layers.append({
            # kernel-layout weights (MXU operand dtype), f32 biases
            "w1f": _flat_taps(w1_t).astype(mxu_dtype),
            "w2f": _flat_taps(w2_t).astype(mxu_dtype),
            "wdf": wd_t[:, :, 0, 0].astype(mxu_dtype),
            "b1": b1.reshape(out_c, 1),
            "b2": b2.reshape(out_c, 1),
            "bd": bd.reshape(out_c, 1),
            # torch-layout f32 copies for the pure-JAX reference check
            "w1_t": w1_t, "w2_t": w2_t, "wd_t": wd_t,
            "b1v": b1, "b2v": b2, "bdv": bd,
        })
        in_c = out_c
    return layers


# ----------------------------------------------------------------------------
# Pure-JAX f32 reference (lax.conv) for validation
# ----------------------------------------------------------------------------
def ref_net(x_nchw, layers, kernel_size):
    def block(x, p, dilation):
        pad = (kernel_size - 1) * dilation

        def conv(inp, w, b):
            y = jax.lax.conv_general_dilated(
                inp, w, window_strides=(1, 1),
                padding=((0, 0), (pad, pad)), rhs_dilation=(1, dilation),
                dimension_numbers=("NCHW", "OIHW", "NCHW"))
            y = y[:, :, :, :-pad]                 # Chomp2d
            return y + b.reshape(1, -1, 1, 1)

        h1 = jnp.tanh(conv(x, p["w1_t"], p["b1v"]))
        h2 = jnp.tanh(conv(h1, p["w2_t"], p["b2v"]))
        res = jax.lax.conv_general_dilated(
            x, p["wd_t"], (1, 1), "VALID",
            dimension_numbers=("NCHW", "OIHW", "NCHW")) + p["bdv"].reshape(1, -1, 1, 1)
        return jax.nn.relu(h2 + res)

    h = x_nchw
    for i, p in enumerate(layers):
        h = block(h, p, 2 ** i)
    return h


# ----------------------------------------------------------------------------
if __name__ == "__main__":
    # Small shapes consistent with the module: NCHW input, 2 GaussBlack levels.
    N, C_IN, H, W = 2, 4, 4, 16
    NUM_CHANNELS = [8, 8]
    KERNEL_SIZE = 2

    key = jax.random.PRNGKey(0)
    kx, kp = jax.random.split(key)
    x = jax.random.normal(kx, (N, C_IN, H, W), jnp.float32)

    # NOTE: g_kernel_data is a frozen Parameter never used in forward(); omitted.
    layers = init_gauss_conv_net(kp, C_IN, NUM_CHANNELS, KERNEL_SIZE)

    out = jax.block_until_ready(gauss_conv_net_pallas(x, layers, KERNEL_SIZE))
    ref = jax.block_until_ready(ref_net(x, layers, KERNEL_SIZE))

    assert out.shape == (N, NUM_CHANNELS[-1], H, W)
    # bf16 MXU operands with f32 accumulation -> tolerance loosened vs f32 reference
    assert jnp.allclose(out, ref, atol=5e-2, rtol=5e-2), "mismatch vs JAX reference"

    print("KERNEL_OK")
</pallas_src>

<mosaic_0001>
module attributes {stable_mosaic.version = 11 : i64} {
  func.func @_fused_gauss_net_kernel(%arg0: i32, %arg1: i32, %arg2: memref<1x4x64xf32, #tpu.memory_space<vmem>>, %arg3: memref<8x8xbf16, #tpu.memory_space<vmem>>, %arg4: memref<8x1xf32, #tpu.memory_space<vmem>>, %arg5: memref<8x16xbf16, #tpu.memory_space<vmem>>, %arg6: memref<8x1xf32, #tpu.memory_space<vmem>>, %arg7: memref<8x4xbf16, #tpu.memory_space<vmem>>, %arg8: memref<8x1xf32, #tpu.memory_space<vmem>>, %arg9: memref<8x16xbf16, #tpu.memory_space<vmem>>, %arg10: memref<8x1xf32, #tpu.memory_space<vmem>>, %arg11: memref<8x16xbf16, #tpu.memory_space<vmem>>, %arg12: memref<8x1xf32, #tpu.memory_space<vmem>>, %arg13: memref<8x8xbf16, #tpu.memory_space<vmem>>, %arg14: memref<8x1xf32, #tpu.memory_space<vmem>>, %arg15: memref<1x8x64xf32, #tpu.memory_space<vmem>>, %arg16: memref<16x64xbf16, #tpu.memory_space<vmem>>) attributes {dimension_semantics = [#tpu.dimension_semantics<parallel>, #tpu.dimension_semantics<parallel>], iteration_bounds = array<i64: 2, 1>, scalar_prefetch = 0 : i64, scratch_operands = 1 : i64, tpu.core_type = #tpu.core_type<tc>, window_params = [{transform_indices = @transform_0, window_bounds = array<i64: 1, 4, 64>}, {pipeline_mode = #tpu.pipeline_mode<synchronous>, transform_indices = @transform_1, window_bounds = array<i64: 8, 8>}, {pipeline_mode = #tpu.pipeline_mode<synchronous>, transform_indices = @transform_2, window_bounds = array<i64: 8, 1>}, {pipeline_mode = #tpu.pipeline_mode<synchronous>, transform_indices = @transform_3, window_bounds = array<i64: 8, 16>}, {pipeline_mode = #tpu.pipeline_mode<synchronous>, transform_indices = @transform_4, window_bounds = array<i64: 8, 1>}, {pipeline_mode = #tpu.pipeline_mode<synchronous>, transform_indices = @transform_5, window_bounds = array<i64: 8, 4>}, {pipeline_mode = #tpu.pipeline_mode<synchronous>, transform_indices = @transform_6, window_bounds = array<i64: 8, 1>}, {pipeline_mode = #tpu.pipeline_mode<synchronous>, transform_indices = @transform_7, window_bounds = array<i64: 8, 16>}, {pipeline_mode = #tpu.pipeline_mode<synchronous>, transform_indices = @transform_8, window_bounds = array<i64: 8, 1>}, {pipeline_mode = #tpu.pipeline_mode<synchronous>, transform_indices = @transform_9, window_bounds = array<i64: 8, 16>}, {pipeline_mode = #tpu.pipeline_mode<synchronous>, transform_indices = @transform_10, window_bounds = array<i64: 8, 1>}, {pipeline_mode = #tpu.pipeline_mode<synchronous>, transform_indices = @transform_11, window_bounds = array<i64: 8, 8>}, {pipeline_mode = #tpu.pipeline_mode<synchronous>, transform_indices = @transform_12, window_bounds = array<i64: 8, 1>}, {transform_indices = @transform_13, window_bounds = array<i64: 1, 8, 64>}]} {
    %0 = tpu.iota {dimensions = array<i32: 1>} : vector<1x64xi32>
    %c16_i32 = arith.constant 16 : i32
    %c0_i32 = arith.constant 0 : i32
    %1 = arith.cmpi eq, %c16_i32, %c0_i32 : i32
    %c1_i32 = arith.constant 1 : i32
    %2 = arith.select %1, %c1_i32, %c16_i32 : i32
    %3 = vector.broadcast %2 : i32 to vector<1x64xi32>
    %4 = arith.remsi %0, %3 : vector<1x64xi32>
    %c0_i32_0 = arith.constant 0 : i32
    %5 = vector.broadcast %c0_i32_0 : i32 to vector<1x64xi32>
    %6 = arith.cmpi ne, %4, %5 : vector<1x64xi32>
    %c0_i32_1 = arith.constant 0 : i32
    %7 = vector.broadcast %c0_i32_1 : i32 to vector<1x64xi32>
    %8 = arith.cmpi slt, %4, %7 : vector<1x64xi32>
    %c0_i32_2 = arith.constant 0 : i32
    %9 = arith.cmpi slt, %2, %c0_i32_2 : i32
    %10 = vector.broadcast %9 : i1 to vector<1x64xi1>
    %11 = vector.broadcast %10 : vector<1x64xi1> to vector<1x64xi1>
    %12 = arith.xori %8, %11 : vector<1x64xi1>
    %13 = arith.andi %12, %6 : vector<1x64xi1>
    %14 = vector.broadcast %2 : i32 to vector<1x64xi32>
    %15 = arith.addi %4, %14 : vector<1x64xi32>
    %16 = arith.select %13, %15, %4 : vector<1x64xi1>, vector<1x64xi32>
    %c0 = arith.constant 0 : index
    %c0_3 = arith.constant 0 : index
    %c0_4 = arith.constant 0 : index
    %17 = vector.load %arg2[%c0, %c0_3, %c0_4] : memref<1x4x64xf32, #tpu.memory_space<vmem>>, vector<1x4x64xf32>
    %18 = vector.shape_cast %17 : vector<1x4x64xf32> to vector<4x64xf32>
    %19 = arith.truncf %18 : vector<4x64xf32> to vector<4x64xbf16>
    %20 = vector.extract_strided_slice %19 {offsets = [0, 63], sizes = [4, 1], strides = [1, 1]} : vector<4x64xbf16> to vector<4x1xbf16>
    %21 = vector.extract_strided_slice %19 {offsets = [0, 0], sizes = [4, 63], strides = [1, 1]} : vector<4x64xbf16> to vector<4x63xbf16>
    %22 = tpu.concatenate %20, %21 in 1 : vector<4x1xbf16>, vector<4x63xbf16> -> vector<4x64xbf16>
    %c1_i32_5 = arith.constant 1 : i32
    %23 = vector.broadcast %c1_i32_5 : i32 to vector<1x64xi32>
    %24 = arith.cmpi sge, %16, %23 : vector<1x64xi32>
    %cst = arith.constant 0.000000e+00 : bf16
    %25 = vector.broadcast %cst : bf16 to vector<4x64xbf16>
    %26 = vector.shape_cast %24 : vector<1x64xi1> to vector<1x64xi1>
    %27 = vector.broadcast %26 : vector<1x64xi1> to vector<4x64xi1>
    %28 = arith.select %27, %22, %25 : vector<4x64xi1>, vector<4x64xbf16>
    %c0_6 = arith.constant 0 : index
    %c0_7 = arith.constant 0 : index
    %29 = vector.load %arg16[%c0_6, %c0_7] : memref<16x64xbf16, #tpu.memory_space<vmem>>, vector<4x64xbf16>
    tpu.vector_store %arg16[%c0_6, %c0_7], %28 {strides = array<i32>} : memref<16x64xbf16, #tpu.memory_space<vmem>>, vector<4x64xbf16>,
    %c4 = arith.constant 4 : index
    %c0_8 = arith.constant 0 : index
    %30 = vector.load %arg16[%c4, %c0_8] : memref<16x64xbf16, #tpu.memory_space<vmem>>, vector<4x64xbf16>
    tpu.vector_store %arg16[%c4, %c0_8], %19 {strides = array<i32>} : memref<16x64xbf16, #tpu.memory_space<vmem>>, vector<4x64xbf16>,
    %c0_9 = arith.constant 0 : index
    %c0_10 = arith.constant 0 : index
    %31 = vector.load %arg3[%c0_9, %c0_10] : memref<8x8xbf16, #tpu.memory_space<vmem>>, vector<8x8xbf16>
    %c0_11 = arith.constant 0 : index
    %c0_12 = arith.constant 0 : index
    %32 = vector.load %arg16[%c0_11, %c0_12] : memref<16x64xbf16, #tpu.memory_space<vmem>>, vector<8x64xbf16>
    %cst_13 = arith.constant dense<0.000000e+00> : vector<8x64xf32>
    %33 = tpu.matmul %31, %32, %cst_13 {dimension_numbers = #tpu.dot_dimension_numbers<[1], [0], [0], [1], [0, 0, 1, 1], [], []>} : vector<8x8xbf16>, vector<8x64xbf16>, vector<8x64xf32> -> vector<8x64xf32>
    %c0_14 = arith.constant 0 : index
    %c0_15 = arith.constant 0 : index
    %34 = vector.load %arg4[%c0_14, %c0_15] : memref<8x1xf32, #tpu.memory_space<vmem>>, vector<8x1xf32>
    %35 = vector.broadcast %34 : vector<8x1xf32> to vector<8x64xf32>
    %36 = arith.addf %33, %35 : vector<8x64xf32>
    %37 = math.tanh %36 : vector<8x64xf32>
    %38 = arith.truncf %37 : vector<8x64xf32> to vector<8x64xbf16>
    %39 = vector.extract_strided_slice %38 {offsets = [0, 63], sizes = [8, 1], strides = [1, 1]} : vector<8x64xbf16> to vector<8x1xbf16>
    %40 = vector.extract_strided_slice %38 {offsets = [0, 0], sizes = [8, 63], strides = [1, 1]} : vector<8x64xbf16> to vector<8x63xbf16>
    %41 = tpu.concatenate %39, %40 in 1 : vector<8x1xbf16>, vector<8x63xbf16> -> vector<8x64xbf16>
    %cst_16 = arith.constant 0.000000e+00 : bf16
    %42 = vector.broadcast %cst_16 : bf16 to vector<8x64xbf16>
    %43 = vector.shape_cast %24 : vector<1x64xi1> to vector<1x64xi1>
    %44 = vector.broadcast %43 : vector<1x64xi1> to vector<8x64xi1>
    %45 = arith.select %44, %41, %42 : vector<8x64xi1>, vector<8x64xbf16>
    %c0_17 = arith.constant 0 : index
    %c0_18 = arith.constant 0 : index
    %46 = vector.load %arg16[%c0_17, %c0_18] : memref<16x64xbf16, #tpu.memory_space<vmem>>, vector<8x64xbf16>
    tpu.vector_store %arg16[%c0_17, %c0_18], %45 {strides = array<i32>} : memref<16x64xbf16, #tpu.memory_space<vmem>>, vector<8x64xbf16>,
    %c8 = arith.constant 8 : index
    %c0_19 = arith.constant 0 : index
    %47 = vector.load %arg16[%c8, %c0_19] : memref<16x64xbf16, #tpu.memory_space<vmem>>, vector<8x64xbf16>
    tpu.vector_store %arg16[%c8, %c0_19], %38 {strides = array<i32>} : memref<16x64xbf16, #tpu.memory_space<vmem>>, vector<8x64xbf16>,
    %c0_20 = arith.constant 0 : index
    %c0_21 = arith.constant 0 : index
    %48 = vector.load %arg5[%c0_20, %c0_21] : memref<8x16xbf16, #tpu.memory_space<vmem>>, vector<8x16xbf16>
    %c0_22 = arith.constant 0 : index
    %c0_23 = arith.constant 0 : index
    %49 = vector.load %arg16[%c0_22, %c0_23] : memref<16x64xbf16, #tpu.memory_space<vmem>>, vector<16x64xbf16>
    %cst_24 = arith.constant dense<0.000000e+00> : vector<8x64xf32>
    %50 = tpu.matmul %48, %49, %cst_24 {dimension_numbers = #tpu.dot_dimension_numbers<[1], [0], [0], [1], [0, 0, 1, 1], [], []>} : vector<8x16xbf16>, vector<16x64xbf16>, vector<8x64xf32> -> vector<8x64xf32>
    %c0_25 = arith.constant 0 : index
    %c0_26 = arith.constant 0 : index
    %51 = vector.load %arg6[%c0_25, %c0_26] : memref<8x1xf32, #tpu.memory_space<vmem>>, vector<8x1xf32>
    %52 = vector.broadcast %51 : vector<8x1xf32> to vector<8x64xf32>
    %53 = arith.addf %50, %52 : vector<8x64xf32>
    %54 = math.tanh %53 : vector<8x64xf32>
    %c0_27 = arith.constant 0 : index
    %c0_28 = arith.constant 0 : index
    %55 = vector.load %arg7[%c0_27, %c0_28] : memref<8x4xbf16, #tpu.memory_space<vmem>>, vector<8x4xbf16>
    %cst_29 = arith.constant dense<0.000000e+00> : vector<8x64xf32>
    %56 = tpu.matmul %55, %19, %cst_29 {dimension_numbers = #tpu.dot_dimension_numbers<[1], [0], [0], [1], [0, 0, 1, 1], [], []>} : vector<8x4xbf16>, vector<4x64xbf16>, vector<8x64xf32> -> vector<8x64xf32>
    %c0_30 = arith.constant 0 : index
    %c0_31 = arith.constant 0 : index
    %57 = vector.load %arg8[%c0_30, %c0_31] : memref<8x1xf32, #tpu.memory_space<vmem>>, vector<8x1xf32>
    %58 = vector.broadcast %57 : vector<8x1xf32> to vector<8x64xf32>
    %59 = arith.addf %56, %58 : vector<8x64xf32>
    %60 = arith.addf %54, %59 : vector<8x64xf32>
    %cst_32 = arith.constant 0.000000e+00 : f32
    %61 = vector.broadcast %cst_32 : f32 to vector<8x64xf32>
    %62 = arith.maximumf %60, %61 : vector<8x64xf32>
    %63 = arith.truncf %62 : vector<8x64xf32> to vector<8x64xbf16>
    %64 = vector.extract_strided_slice %63 {offsets = [0, 62], sizes = [8, 2], strides = [1, 1]} : vector<8x64xbf16> to vector<8x2xbf16>
    %65 = vector.extract_strided_slice %63 {offsets = [0, 0], sizes = [8, 62], strides = [1, 1]} : vector<8x64xbf16> to vector<8x62xbf16>
    %66 = tpu.concatenate %64, %65 in 1 : vector<8x2xbf16>, vector<8x62xbf16> -> vector<8x64xbf16>
    %c2_i32 = arith.constant 2 : i32
    %67 = vector.broadcast %c2_i32 : i32 to vector<1x64xi32>
    %68 = arith.cmpi sge, %16, %67 : vector<1x64xi32>
    %cst_33 = arith.constant 0.000000e+00 : bf16
    %69 = vector.broadcast %cst_33 : bf16 to vector<8x64xbf16>
    %70 = vector.shape_cast %68 : vector<1x64xi1> to vector<1x64xi1>
    %71 = vector.broadcast %70 : vector<1x64xi1> to vector<8x64xi1>
    %72 = arith.select %71, %66, %69 : vector<8x64xi1>, vector<8x64xbf16>
    %c0_34 = arith.constant 0 : index
    %c0_35 = arith.constant 0 : index
    %73 = vector.load %arg16[%c0_34, %c0_35] : memref<16x64xbf16, #tpu.memory_space<vmem>>, vector<8x64xbf16>
    tpu.vector_store %arg16[%c0_34, %c0_35], %72 {strides = array<i32>} : memref<16x64xbf16, #tpu.memory_space<vmem>>, vector<8x64xbf16>,
    %c8_36 = arith.constant 8 : index
    %c0_37 = arith.constant 0 : index
    %74 = vector.load %arg16[%c8_36, %c0_37] : memref<16x64xbf16, #tpu.memory_space<vmem>>, vector<8x64xbf16>
    tpu.vector_store %arg16[%c8_36, %c0_37], %63 {strides = array<i32>} : memref<16x64xbf16, #tpu.memory_space<vmem>>, vector<8x64xbf16>,
    %c0_38 = arith.constant 0 : index
    %c0_39 = arith.constant 0 : index
    %75 = vector.load %arg9[%c0_38, %c0_39] : memref<8x16xbf16, #tpu.memory_space<vmem>>, vector<8x16xbf16>
    %c0_40 = arith.constant 0 : index
    %c0_41 = arith.constant 0 : index
    %76 = vector.load %arg16[%c0_40, %c0_41] : memref<16x64xbf16, #tpu.memory_space<vmem>>, vector<16x64xbf16>
    %cst_42 = arith.constant dense<0.000000e+00> : vector<8x64xf32>
    %77 = tpu.matmul %75, %76, %cst_42 {dimension_numbers = #tpu.dot_dimension_numbers<[1], [0], [0], [1], [0, 0, 1, 1], [], []>} : vector<8x16xbf16>, vector<16x64xbf16>, vector<8x64xf32> -> vector<8x64xf32>
    %c0_43 = arith.constant 0 : index
    %c0_44 = arith.constant 0 : index
    %78 = vector.load %arg10[%c0_43, %c0_44] : memref<8x1xf32, #tpu.memory_space<vmem>>, vector<8x1xf32>
    %79 = vector.broadcast %78 : vector<8x1xf32> to vector<8x64xf32>
    %80 = arith.addf %77, %79 : vector<8x64xf32>
    %81 = math.tanh %80 : vector<8x64xf32>
    %82 = arith.truncf %81 : vector<8x64xf32> to vector<8x64xbf16>
    %83 = vector.extract_strided_slice %82 {offsets = [0, 62], sizes = [8, 2], strides = [1, 1]} : vector<8x64xbf16> to vector<8x2xbf16>
    %84 = vector.extract_strided_slice %82 {offsets = [0, 0], sizes = [8, 62], strides = [1, 1]} : vector<8x64xbf16> to vector<8x62xbf16>
    %85 = tpu.concatenate %83, %84 in 1 : vector<8x2xbf16>, vector<8x62xbf16> -> vector<8x64xbf16>
    %cst_45 = arith.constant 0.000000e+00 : bf16
    %86 = vector.broadcast %cst_45 : bf16 to vector<8x64xbf16>
    %87 = vector.shape_cast %68 : vector<1x64xi1> to vector<1x64xi1>
    %88 = vector.broadcast %87 : vector<1x64xi1> to vector<8x64xi1>
    %89 = arith.select %88, %85, %86 : vector<8x64xi1>, vector<8x64xbf16>
    %c0_46 = arith.constant 0 : index
    %c0_47 = arith.constant 0 : index
    %90 = vector.load %arg16[%c0_46, %c0_47] : memref<16x64xbf16, #tpu.memory_space<vmem>>, vector<8x64xbf16>
    tpu.vector_store %arg16[%c0_46, %c0_47], %89 {strides = array<i32>} : memref<16x64xbf16, #tpu.memory_space<vmem>>, vector<8x64xbf16>,
    %c8_48 = arith.constant 8 : index
    %c0_49 = arith.constant 0 : index
    %91 = vector.load %arg16[%c8_48, %c0_49] : memref<16x64xbf16, #tpu.memory_space<vmem>>, vector<8x64xbf16>
    tpu.vector_store %arg16[%c8_48, %c0_49], %82 {strides = array<i32>} : memref<16x64xbf16, #tpu.memory_space<vmem>>, vector<8x64xbf16>,
    %c0_50 = arith.constant 0 : index
    %c0_51 = arith.constant 0 : index
    %92 = vector.load %arg11[%c0_50, %c0_51] : memref<8x16xbf16, #tpu.memory_space<vmem>>, vector<8x16xbf16>
    %c0_52 = arith.constant 0 : index
    %c0_53 = arith.constant 0 : index
    %93 = vector.load %arg16[%c0_52, %c0_53] : memref<16x64xbf16, #tpu.memory_space<vmem>>, vector<16x64xbf16>
    %cst_54 = arith.constant dense<0.000000e+00> : vector<8x64xf32>
    %94 = tpu.matmul %92, %93, %cst_54 {dimension_numbers = #tpu.dot_dimension_numbers<[1], [0], [0], [1], [0, 0, 1, 1], [], []>} : vector<8x16xbf16>, vector<16x64xbf16>, vector<8x64xf32> -> vector<8x64xf32>
    %c0_55 = arith.constant 0 : index
    %c0_56 = arith.constant 0 : index
    %95 = vector.load %arg12[%c0_55, %c0_56] : memref<8x1xf32, #tpu.memory_space<vmem>>, vector<8x1xf32>
    %96 = vector.broadcast %95 : vector<8x1xf32> to vector<8x64xf32>
    %97 = arith.addf %94, %96 : vector<8x64xf32>
    %98 = math.tanh %97 : vector<8x64xf32>
    %c0_57 = arith.constant 0 : index
    %c0_58 = arith.constant 0 : index
    %99 = vector.load %arg13[%c0_57, %c0_58] : memref<8x8xbf16, #tpu.memory_space<vmem>>, vector<8x8xbf16>
    %cst_59 = arith.constant dense<0.000000e+00> : vector<8x64xf32>
    %100 = tpu.matmul %99, %63, %cst_59 {dimension_numbers = #tpu.dot_dimension_numbers<[1], [0], [0], [1], [0, 0, 1, 1], [], []>} : vector<8x8xbf16>, vector<8x64xbf16>, vector<8x64xf32> -> vector<8x64xf32>
    %c0_60 = arith.constant 0 : index
    %c0_61 = arith.constant 0 : index
    %101 = vector.load %arg14[%c0_60, %c0_61] : memref<8x1xf32, #tpu.memory_space<vmem>>, vector<8x1xf32>
    %102 = vector.broadcast %101 : vector<8x1xf32> to vector<8x64xf32>
    %103 = arith.addf %100, %102 : vector<8x64xf32>
    %104 = arith.addf %98, %103 : vector<8x64xf32>
    %cst_62 = arith.constant 0.000000e+00 : f32
    %105 = vector.broadcast %cst_62 : f32 to vector<8x64xf32>
    %106 = arith.maximumf %104, %105 : vector<8x64xf32>
    %c0_63 = arith.constant 0 : index
    %c0_64 = arith.constant 0 : index
    %c0_65 = arith.constant 0 : index
    %107 = vector.load %arg15[%c0_63, %c0_64, %c0_65] : memref<1x8x64xf32, #tpu.memory_space<vmem>>, vector<1x8x64xf32>
    %108 = vector.shape_cast %107 : vector<1x8x64xf32> to vector<8x64xf32>
    %109 = vector.shape_cast %106 : vector<8x64xf32> to vector<1x8x64xf32>
    tpu.vector_store %arg15[%c0_63, %c0_64, %c0_65], %109 {strides = array<i32>} : memref<1x8x64xf32, #tpu.memory_space<vmem>>, vector<1x8x64xf32>,
    return
  }
  func.func @transform_0(%arg0: i32, %arg1: i32) -> (i32, i32, i32) {
    %c0_i32 = arith.constant 0 : i32
    %c0_i32_0 = arith.constant 0 : i32
    return %arg0, %c0_i32, %arg1 : i32, i32, i32
  }
  func.func @transform_1(%arg0: i32, %arg1: i32) -> (i32, i32) {
    %c0_i32 = arith.constant 0 : i32
    %c0_i32_0 = arith.constant 0 : i32
    %c0_i32_1 = arith.constant 0 : i32
    return %c0_i32, %c0_i32_0 : i32, i32
  }
  func.func @transform_2(%arg0: i32, %arg1: i32) -> (i32, i32) {
    %c0_i32 = arith.constant 0 : i32
    %c0_i32_0 = arith.constant 0 : i32
    %c0_i32_1 = arith.constant 0 : i32
    return %c0_i32, %c0_i32_0 : i32, i32
  }
  func.func @transform_3(%arg0: i32, %arg1: i32) -> (i32, i32) {
    %c0_i32 = arith.constant 0 : i32
    %c0_i32_0 = arith.constant 0 : i32
    %c0_i32_1 = arith.constant 0 : i32
    return %c0_i32, %c0_i32_0 : i32, i32
  }
  func.func @transform_4(%arg0: i32, %arg1: i32) -> (i32, i32) {
    %c0_i32 = arith.constant 0 : i32
    %c0_i32_0 = arith.constant 0 : i32
    %c0_i32_1 = arith.constant 0 : i32
    return %c0_i32, %c0_i32_0 : i32, i32
  }
  func.func @transform_5(%arg0: i32, %arg1: i32) -> (i32, i32) {
    %c0_i32 = arith.constant 0 : i32
    %c0_i32_0 = arith.constant 0 : i32
    %c0_i32_1 = arith.constant 0 : i32
    return %c0_i32, %c0_i32_0 : i32, i32
  }
  func.func @transform_6(%arg0: i32, %arg1: i32) -> (i32, i32) {
    %c0_i32 = arith.constant 0 : i32
    %c0_i32_0 = arith.constant 0 : i32
    %c0_i32_1 = arith.constant 0 : i32
    return %c0_i32, %c0_i32_0 : i32, i32
  }
  func.func @transform_7(%arg0: i32, %arg1: i32) -> (i32, i32) {
    %c0_i32 = arith.constant 0 : i32
    %c0_i32_0 = arith.constant 0 : i32
    %c0_i32_1 = arith.constant 0 : i32
    return %c0_i32, %c0_i32_0 : i32, i32
  }
  func.func @transform_8(%arg0: i32, %arg1: i32) -> (i32, i32) {
    %c0_i32 = arith.constant 0 : i32
    %c0_i32_0 = arith.constant 0 : i32
    %c0_i32_1 = arith.constant 0 : i32
    return %c0_i32, %c0_i32_0 : i32, i32
  }
  func.func @transform_9(%arg0: i32, %arg1: i32) -> (i32, i32) {
    %c0_i32 = arith.constant 0 : i32
    %c0_i32_0 = arith.constant 0 : i32
    %c0_i32_1 = arith.constant 0 : i32
    return %c0_i32, %c0_i32_0 : i32, i32
  }
  func.func @transform_10(%arg0: i32, %arg1: i32) -> (i32, i32) {
    %c0_i32 = arith.constant 0 : i32
    %c0_i32_0 = arith.constant 0 : i32
    %c0_i32_1 = arith.constant 0 : i32
    return %c0_i32, %c0_i32_0 : i32, i32
  }
  func.func @transform_11(%arg0: i32, %arg1: i32) -> (i32, i32) {
    %c0_i32 = arith.constant 0 : i32
    %c0_i32_0 = arith.constant 0 : i32
    %c0_i32_1 = arith.constant 0 : i32
    return %c0_i32, %c0_i32_0 : i32, i32
  }
  func.func @transform_12(%arg0: i32, %arg1: i32) -> (i32, i32) {
    %c0_i32 = arith.constant 0 : i32
    %c0_i32_0 = arith.constant 0 : i32
    %c0_i32_1 = arith.constant 0 : i32
    return %c0_i32, %c0_i32_0 : i32, i32
  }
  func.func @transform_13(%arg0: i32, %arg1: i32) -> (i32, i32, i32) {
    %c0_i32 = arith.constant 0 : i32
    %c0_i32_0 = arith.constant 0 : i32
    return %arg0, %c0_i32, %arg1 : i32, i32, i32
  }
}

</mosaic_0001>

<bundles_post_ra>
// kernel: tpu_custom_call.1
= control target key start
LH: loop header
LB: loop body
LE: loop exit
PB: predicated region body
PF: predicated region fallthrough
CT: control target
= control target key end

     0   :  { %s1490_s0 = inlined_call_operand.vmem [shape: f32[2,4,64], index: 0, kind: input, shape index: {}]   ;;  %s1491_s1 = inlined_call_operand.vmem [shape: bf16[8,8], index: 1, kind: input, shape index: {}]   ;;  %s1492_s2 = inlined_call_operand.vmem [shape: f32[8,1], index: 2, kind: input, shape index: {}]   ;;  %s1493_s3 = inlined_call_operand.vmem [shape: bf16[8,16], index: 3, kind: input, shape index: {}]   ;;  %s1494_s4 = inlined_call_operand.vmem [shape: f32[8,1], index: 4, kind: input, shape index: {}]   ;;  %s1495_s5 = inlined_call_operand.vmem [shape: bf16[8,4], index: 5, kind: input, shape index: {}]   ;;  %s1496_s6 = inlined_call_operand.vmem [shape: f32[8,1], index: 6, kind: input, shape index: {}]   ;;  %s1497_s7 = inlined_call_operand.vmem [shape: bf16[8,16], index: 7, kind: input, shape index: {}]   ;;  %s1498_s8 = inlined_call_operand.vmem [shape: f32[8,1], index: 8, kind: input, shape index: {}]   ;;  %s1499_s9 = inlined_call_operand.vmem [shape: bf16[8,16], index: 9, kind: input, shape index: {}]   ;;  %s1500_s10 = inlined_call_operand.vmem [shape: f32[8,1], index: 10, kind: input, shape index: {}]   ;;  %s1501_s11 = inlined_call_operand.vmem [shape: bf16[8,8], index: 11, kind: input, shape index: {}]   ;;  %s1502_s12 = inlined_call_operand.vmem [shape: f32[8,1], index: 12, kind: input, shape index: {}]   ;;  %s1503_s13 = inlined_call_operand.hbm [shape: f32[2,8,64], index: 13, kind: output, shape index: {}]  }
   0x1   :  { %1504 = sst [smem:[#allocation6_spill]] %s1490_s0 }
   0x2   :  { %1505 = sst [smem:[#allocation7_spill]] %s1491_s1 }
   0x3   :  { %1506 = sst [smem:[#allocation8_spill]] %s1492_s2 }
   0x4   :  { %1507 = sst [smem:[#allocation9_spill]] %s1493_s3 }
   0x5   :  { %18 = vsyncpa [#allocation4], 0 }
   0x6   :  { %20 = vsyncpa [#allocation4 + $0x1], 0  ;;  %s1260_s25 = smov 0   ;;  %s1262_s26 = smov 0  }
   0x7   :  { %s1264_s27 = smov 0   ;;  %s1266_s28 = smov 0  }
   0x8   :  { %s1268_s29 = smov 0   ;;  %s1270_s30 = smov 0  }
   0x9 LB: > { %s965_s14 = sadd.s32 4294967295, %s1180_s30   ;;  %s966_s15 = sadd.s32 4294967294, %s1180_s30   ;;  %s1180_s30 = sphi %s1270_s30, %s26_s30   ;;  %s1176_s29 = sphi %s1268_s29, %s1522_s29   ;;  %s1172_s28 = sphi %s1266_s28, %s1521_s28   ;;  %s1168_s27 = sphi %s1264_s27, %s1520_s27   ;;  %s1164_s26 = sphi %s1262_s26, %s1519_s26   ;;  %s1160_s25 = sphi %s1260_s25, %s1518_s25  }
   0xa   : > { %s38_s16 = sadd.s32 1, %s1176_s29  ;;  %s327_s17 = sadd.s32 1, %s1168_s27 }
   0xb   : > { %p40_p0 = scmp.ge.s32.totalorder %s38_s16, 2  ;;  %p337_p1 = scmp.ne.s32.totalorder %s1168_s27, %s1164_s26 }
   0xc   : > { %p338_p2 = scmp.eq.s32.totalorder %s965_s14, 1  ;;  %p343_p3 = scmp.ne.s32.totalorder %s1164_s26, %s1160_s25 }
   0xd   : > { %s1524_s16 = smov (%p40_p0, %s38_s16), 0  ;;  %p344_p5 = scmp.eq.s32.totalorder %s966_s15, 1 }
   0xe   : > { %p1300_p4 = por %p338_p2, %p337_p1  ;;  %s322_s19 = ssub.s32 %s1176_s29, %s1524_s16 }
   0xf   : > { %p969_p6 = scmp.ge.s32.totalorder %s1180_s30, 1  ;;  %p325_p7 = scmp.eq.s32.totalorder %s322_s19, 0 }
  0x10   : > { %p1307_p8 = por %p344_p5, %p343_p3  ;;  %p408_p9 = scmp.lt.s32.totalorder %s1180_s30, 3 }
  0x11   : > { %s1313_s21 = scalar_select %p325_p7, %s1168_s27, %s327_s17  }
  0x12   : > { %p409_p10 = pnand %p969_p6, %p408_p9 }
  0x13   : > { %p454_p11 = scmp.lt.s32.totalorder (!%p409_p10), %s1172_s28, 1  ;;  %v1182_v0 = vmov (!%p409_p10), 0.0   ;;  %s1510_s0 = sld [smem:[#allocation6_spill]] (!%p409_p10)  ;;  %vm497_vm0 = vcmask (!%p409_p10), 519170   ;;  %vm1184_vm1 = vmmov (!%p409_p10), 0   ;;  %v1186_v5 = vmov (!%p409_p10), 0  }
  0x14   : > { %412 = sbr.rel (%p409_p10) target bundleno = 1483 (0x5cb), region = 72  ;;  %994 = vmatprep.subr.bf16.mxu0 (!%p409_p10), %v1182_v0  ;;  %1000 = vmatprep.subr.bf16.mxu1 (!%p409_p10), %v1182_v0  ;;  %s1183_s17 = smov (!%p409_p10), 65   ;;  %v462_v6 = vlaneseq (!%p409_p10)  ;;  %vm483_vm3 = vcmask (!%p409_p10), 7168   ;;  %vm493_vm5 = vcmask (!%p409_p10), 517120   ;;  %vm511_vm6 = vcmask (!%p409_p10), 1043456   ;;  %v575_v26 = vld [vmem:[%s1494_s4] sm:$0xff] (!%p409_p10) }
  0x15   : > { %996 = vmatprep.mubr.msk.bf16.mxu0 (!%p409_p10), %vm1184_vm1, %v1182_v0  ;;  %1002 = vmatprep.mubr.msk.bf16.mxu1 (!%p409_p10), %vm1184_vm1, %v1182_v0  ;;  %s1185_s19 = smov (!%p409_p10), 1   ;;  %s1511_s2 = sld [smem:[#allocation8_spill]] (!%p409_p10)  ;;  %vm507_vm7 = vcmask (!%p409_p10), 64512   ;;  %vm571_vm8 = vcmask (!%p409_p10), 523268   ;;  %vm637_vm9 = vcmask (!%p409_p10), 1041408   ;;  %v627_v27 = vld [vmem:[%s1496_s6] sm:$0xff] (!%p409_p10) }
  0x16   : > { %1092 = vset.pattern.permute.xlu1 (!%p409_p10), %v1186_v5  ;;  %1093 = vset.pattern.permute.xlu0 (!%p409_p10), %v1186_v5  ;;  %v1331_v7 = vand.u32 (!%p409_p10), 127, %v462_v6  ;;  %s1514_s1 = sld [smem:[#allocation7_spill]] (!%p409_p10)  ;;  %v626_v29 = vld [vmem:[%s1495_s5] sm:$0xf] (!%p409_p10)  ;;  %vm633_vm10 = vcmask (!%p409_p10), 31744   ;;  %vm567_vm11 = vcmask (!%p409_p10), 519168  }
  0x17   : > { %v705_v30 = vld [vmem:[%s1498_s8] sm:$0xff] (!%p409_p10)  ;;  %s1515_s3 = sld [smem:[#allocation9_spill]] (!%p409_p10)  ;;  %vm581_vm12 = vcmask (!%p409_p10), 130048   ;;  %vm689_vm14 = vcmask (!%p409_p10), 15360  }
  0x18   : > { %v468_v8 = vand.u32 (!%p409_p10), 15, %v1331_v7  ;;  %v703_v60 = vld [vmem:[%s1497_s7] sm:$0xf] (!%p409_p10) }
  0x19   : > { %v822_v62 = vld [vmem:[%s1501_s11] sm:$0xf] (!%p409_p10) }
  0x1a   : > { %vm1336_vm2 = vcmp.ge.s32.totalorder (!%p409_p10), %v468_v8, 1  ;;  %vm1393_vm13 = vcmp.ge.s32.totalorder (!%p409_p10), %v468_v8, 2 }
  0x1b   : > { %s455_s22 = scalar_select %p454_p11, %s1172_s28, 1  ;;  %v501_v4 = vld [vmem:[%s1511_s2] sm:$0xff]  ;;  %vm491_vm4 = vmpackc.low %vm1336_vm2, %vm1336_vm2 }
  0x1c   : > { %504 = vperm.xlu1 %1092, %v501_v4   ;;  %v499_v16 = vld [vmem:[%s1514_s1] sm:$0xf]  ;;  %vm697_vm15 = vmpackc.low %vm1393_vm13, %vm1393_vm13 }
  0x1d   : > { %s971_s23 = sshll.u32 %s455_s22, 2  ;;  %v573_v36 = vld [vmem:[%s1515_s3] sm:$0xf]  ;;  %s1187_s22 = smov 66  }
  0x1e   : > { %s460_s15 = scalar_lea.vmem %s1510_s0, %s971_s23  ;;  %s1188_s23 = smov 2  }
  0x1f   : > { %v476_v1 = vld [vmem:[%s460_s15] sm:$0xf]  ;;  %s979_s0 = sshll.u32 %s1172_s28, 7  ;;  %s1189_s28 = smov [#allocation3]  }
  0x20   : > { %v477_v2 = vpack.c.bf16 %v476_v1, %v476_v1 }
  0x22   : > { %479 = vrot.lane.b32.xlu0 %v477_v2, %s1183_s17  ;;  %v495_v3 = vrot.slane %v477_v2, 6  ;;  %v639_v28 = vsel %vm637_vm9, %v477_v2, 0 }
  0x24   : > { %498 = vst.msk [vmem:[#allocation2] sm:$0xc] %vm497_vm0, %v495_v3  ;;  %vm877_vm0 = vcmask 523264  }
  0x26   : > { %481 = vrot.lane.b32.xlu0 %v477_v2, %s1185_s19 }
  0x94   : > { %v480_v9 = vpop.permute.xlu0 %479 }
  0x98   : > { %v482_v11 = vpop.permute.xlu0 %481 }
  0x99   : > { %v486_v12 = vsel %vm483_vm3, %v480_v9, %v482_v11  ;;  %v772_v9 = vld [vmem:[%s1500_s10] sm:$0xff] }
  0x9a   : > { %v492_v13 = vsel %vm491_vm4, %v486_v12, 0 }
  0x9b   : > { %494 = vst.msk [vmem:[#allocation2] sm:$0x3] %vm493_vm5, %v492_v13  ;;  %v505_v17 = vpop.permute.xlu1 %504 }
  0xa2   : > { %v500_v14 = vld [vmem:[#allocation2] sm:$0xf] }
  0xa3   : > { %v513_v15 = vsel %vm511_vm6, %v500_v14, 0 }
  0xa4   : > { %995 = vmatpush3.bf16.msra.mxu0 %v513_v15 }
  0xa5   : > { %1006 = vmatprep.subr.bf16.mxu0 %v1182_v0 }
  0xa7   : > { %997 = vmatmul.mubr.msk.bf16.vlgmr.msra.gmra.mrb[0].mxu0 %vm507_vm7, %v499_v16 }
  0xa8   : > { %1008 = vmatprep.mubr.msk.bf16.mxu0 %vm1184_vm1, %v1182_v0  ;;  %1007 = vmatpush3.bf16.msra.mxu0 %v639_v28 }
  0xa9   : > { %1018 = vmatprep.subr.bf16.mxu0 %v1182_v0 }
  0xaf   : > { %1009 = vmatmul.mubr.msk.bf16.vlgmr.msra.gmra.mrb[4].mxu0 %vm633_vm10, %v626_v29 }
  0xb0   : > { %1020 = vmatprep.mubr.msk.bf16.mxu0 %vm1184_vm1, %v1182_v0 }
 0x17a   : > { %v549_v18 = vpop.f32.mrb[0].mxu0 }
 0x17b   : > { %v550_v19 = vadd.f32 %v549_v18, %v505_v17  ;;  %v998_v20 = vpop.f32.mrb[1].mxu0 }
 0x17c   : > { %v552_v21 = vpop.f32.mrb[2].mxu0 }
 0x17d   : > { %1094 = vtanh.f32 %v550_v19  ;;  %v999_v22 = vpop.f32.mrb[3].mxu0  ;;  %v770_v19 = vld [vmem:[%s1499_s9] sm:$0xf] }
 0x182   : > { %v675_v37 = vpop.f32.mrb[4].mxu0 }
 0x183   : > { %v1010_v38 = vpop.f32.mrb[5].mxu0 }
 0x184   : > { %v678_v39 = vpop.f32.mrb[6].mxu0 }
 0x185   : > { %v1011_v40 = vpop.f32.mrb[7].mxu0 }
 0x187   : > { %v1095_v23 = vpop.eup %1094 }
 0x188   : > { %v556_v24 = vpack.c.bf16 %v1095_v23, %v1095_v23 }
 0x18a   : > { %v569_v25 = vrot.slane %v556_v24, 4  ;;  %560 = vrot.lane.b32.xlu0 %v556_v24, %s1185_s19  ;;  %558 = vrot.lane.b32.xlu1 %v556_v24, %s1183_s17  ;;  %s451_s17 = sand.u32 1, %s1164_s26  }
 0x18b   : > { %s970_s19 = sshll.u32 %s451_s17, 3  ;;  %s880_s1 = scalar_lea.sflag [#allocation4], %s451_s17 }
 0x18c   : > { %572 = vst.msk [vmem:[#allocation2] sm:$0xf0] %vm571_vm8, %v569_v25  ;;  %s453_s15 = scalar_lea.vmem [#allocation3], %s970_s19  ;;  %s1106_s19 = sshll.u32 %s1189_s28, 4  ;;  %s1107_s19 = int_to_ptr.vmem [resolvable:$false] %s1106_s19 }
 0x18d   : > { %s894_s24 = sshll.u32 %s453_s15, 4  ;;  %s1108_s3 = scalar_lea.vmem %s1107_s19, 256  ;;  %s1445_s24 = int_to_ptr.vmem [resolvable:$true] %s894_s24 }
 0x18e   : > { %578 = vperm.xlu1 %1092, %v575_v26   ;;  %630 = vperm.xlu0 %1093, %v627_v27   ;;  %s1102_s2 = scalar_lea.vmem %s1445_s24, 128  ;;  %p1109_p1 = scmp.lt.s32.totalorder %s1445_s24, %s1107_s19 }
 0x18f   : > { %p1103_p12 = scmp.ne.s32.totalorder %s1445_s24, %s1102_s2  ;;  %p1110_p2 = scmp.lt.s32.totalorder %s1108_s3, %s1102_s2 }
 0x191   : > { %p1104_p13 = pnand %p1103_p12, %p1300_p4  ;;  %p1111_p3 = por %p1110_p2, %p1109_p1 }
 0x192   : > { %708 = vperm.xlu0 %1093, %v705_v30  }
 0x193   : > { %p1105_p0 = pneg %p1104_p13 }
 0x195   : > { %p1112_p5 = pnand %p1111_p3, %p1105_p0 }
 0x1fc   : > { %v561_v31 = vpop.permute.xlu0 %560  ;;  %v559_v32 = vpop.permute.xlu1 %558 }
 0x1fd   : > { %v564_v33 = vsel %vm483_vm3, %v559_v32, %v561_v31 }
 0x1fe   : > { %v566_v34 = vsel %vm491_vm4, %v564_v33, 0 }
 0x1ff   : > { %568 = vst.msk [vmem:[#allocation2] sm:$0xf] %vm567_vm11, %v566_v34 }
 0x206   : > { %v574_v35 = vld [vmem:[#allocation2] sm:$0xff] }
 0x207   : > { %1001 = vmatpush3.bf16.msra.mxu1 %v574_v35 }
 0x208   : > { %1012 = vmatprep.subr.bf16.mxu1 %v1182_v0 }
 0x20a   : > { %1003 = vmatmul.mubr.msk.bf16.vlgmr.msra.gmra.mrb[0].mxu1 %vm581_vm12, %v573_v36 }
 0x20b   : > { %1014 = vmatprep.mubr.msk.bf16.mxu1 %vm1184_vm1, %v1182_v0 }
 0x20d   : > { %v579_v41 = vpop.permute.xlu1 %578  ;;  %v631_v47 = vpop.permute.xlu0 %630 }
 0x20e   : > { %v676_v48 = vadd.f32 %v675_v37, %v631_v47 }
 0x211   : > { %v709_v63 = vpop.permute.xlu0 %708 }
 0x2dd   : > { %v619_v42 = vpop.f32.mrb[0].mxu1 }
 0x2de   : > { %v620_v43 = vadd.f32 %v619_v42, %v579_v41  ;;  %v1004_v44 = vpop.f32.mrb[1].mxu1 }
 0x2df   : > { %v622_v45 = vpop.f32.mrb[2].mxu1 }
 0x2e0   : > { %1096 = vtanh.f32 %v620_v43  ;;  %v1005_v46 = vpop.f32.mrb[3].mxu1 }
 0x2ea   : > { %v1097_v49 = vpop.eup %1096 }
 0x2eb   : > { %v681_v50 = vadd.f32 %v1097_v49, %v676_v48 }
 0x2ed   : > { %v682_v51 = vmax.f32 %v681_v50, 0.0 }
 0x2ef   : > { %v683_v52 = vpack.c.bf16 %v682_v51, %v682_v51 }
 0x2f1   : > { %v700_v53 = vrot.slane %v683_v52, 4  ;;  %685 = vrot.lane.b32.xlu1 %v683_v52, %s1187_s22  ;;  %v833_v61 = vsel %vm511_vm6, %v683_v52, 0 }
 0x2f3   : > { %702 = vst.msk [vmem:[#allocation2] sm:$0xf0] %vm571_vm8, %v700_v53 }
 0x2f5   : > { %687 = vrot.lane.b32.xlu1 %v683_v52, %s1188_s23 }
 0x363   : > { %v686_v54 = vpop.permute.xlu1 %685 }
 0x367   : > { %v688_v56 = vpop.permute.xlu1 %687 }
 0x368   : > { %v692_v57 = vsel %vm689_vm14, %v686_v54, %v688_v56 }
 0x369   : > { %v698_v58 = vsel %vm697_vm15, %v692_v57, 0 }
 0x36a   : > { %699 = vst.msk [vmem:[#allocation2] sm:$0xf] %vm567_vm11, %v698_v58 }
 0x371   : > { %v704_v59 = vld [vmem:[#allocation2] sm:$0xff] }
 0x372   : > { %1013 = vmatpush3.bf16.msra.mxu1 %v704_v59 }
 0x373   : > { %1024 = vmatprep.subr.bf16.mxu1 %v1182_v0 }
 0x375   : > { %1015 = vmatmul.mubr.msk.bf16.vlgmr.msra.gmra.mrb[4].mxu1 %vm581_vm12, %v703_v60 }
 0x376   : > { %1025 = vmatpush3.bf16.msra.mxu1 %v833_v61  ;;  %1026 = vmatprep.mubr.msk.bf16.mxu1 %vm1184_vm1, %v1182_v0  ;;  %v823_v0 = vld [vmem:[%s1502_s12] sm:$0xff] }
 0x37d   : > { %1027 = vmatmul.mubr.msk.bf16.vlgmr.msra.gmra.mrb[8].mxu1 %vm507_vm7, %v822_v62 }
 0x448   : > { %v748_v1 = vpop.f32.mrb[4].mxu1 }
 0x449   : > { %v749_v2 = vadd.f32 %v748_v1, %v709_v63  ;;  %v1016_v3 = vpop.f32.mrb[5].mxu1 }
 0x44a   : > { %v751_v4 = vpop.f32.mrb[6].mxu1 }
 0x44b   : > { %1098 = vtanh.f32 %v749_v2  ;;  %v1017_v5 = vpop.f32.mrb[7].mxu1 }
 0x450   : > { %v869_v10 = vpop.f32.mrb[8].mxu1 }
 0x451   : > { %v1028_v11 = vpop.f32.mrb[9].mxu1 }
 0x452   : > { %v872_v12 = vpop.f32.mrb[10].mxu1 }
 0x453   : > { %v1029_v13 = vpop.f32.mrb[11].mxu1 }
 0x455   : > { %v1099_v6 = vpop.eup %1098 }
 0x456   : > { %v755_v7 = vpack.c.bf16 %v1099_v6, %v1099_v6 }
 0x458   : > { %v767_v8 = vrot.slane %v755_v7, 4  ;;  %759 = vrot.lane.b32.xlu0 %v755_v7, %s1188_s23  ;;  %757 = vrot.lane.b32.xlu1 %v755_v7, %s1187_s22  ;;  %s1443_s23 = scalar_lea.hbm %s1503_s13, %s979_s0 }
 0x45a   : > { %769 = vst.msk [vmem:[#allocation2] sm:$0xf0] %vm571_vm8, %v767_v8 }
 0x45c   : > { %826 = vperm.xlu0 %1093, %v823_v0   ;;  %775 = vperm.xlu1 %1092, %v772_v9  }
 0x4ca   : > { %v760_v14 = vpop.permute.xlu0 %759  ;;  %v758_v15 = vpop.permute.xlu1 %757 }
 0x4cb   : > { %v763_v16 = vsel %vm689_vm14, %v758_v15, %v760_v14 }
 0x4cc   : > { %v765_v17 = vsel %vm697_vm15, %v763_v16, 0 }
 0x4cd   : > { %766 = vst.msk [vmem:[#allocation2] sm:$0xf] %vm567_vm11, %v765_v17 }
 0x4d4   : > { %v771_v18 = vld [vmem:[#allocation2] sm:$0xff] }
 0x4d5   : > { %1019 = vmatpush3.bf16.msra.mxu0 %v771_v18 }
 0x4d8   : > { %1021 = vmatmul.mubr.msk.bf16.vlgmr.msra.gmra.mrb[8].mxu0 %vm581_vm12, %v770_v19 }
 0x4db   : > { %v776_v20 = vpop.permute.xlu1 %775  ;;  %v827_v26 = vpop.permute.xlu0 %826 }
 0x4dc   : > { %v870_v27 = vadd.f32 %v869_v10, %v827_v26 }
 0x5ab   : > { %v815_v21 = vpop.f32.mrb[8].mxu0 }
 0x5ac   : > { %v816_v22 = vadd.f32 %v815_v21, %v776_v20  ;;  %v1022_v23 = vpop.f32.mrb[9].mxu0 }
 0x5ad   : > { %v818_v24 = vpop.f32.mrb[10].mxu0 }
 0x5ae   : > { %1100 = vtanh.f32 %v816_v22  ;;  %v1023_v25 = vpop.f32.mrb[11].mxu0 }
 0x5b8   : > { %v1101_v28 = vpop.eup %1100 }
 0x5b9   : > { %v875_v29 = vadd.f32 %v1101_v28, %v870_v27 }
 0x5bb   : > { %v876_v30 = vmax.f32 %v875_v29, 0.0 }
 0x5bd   : > { %878 = vst.msk [vmem:[%s453_s15] sm:$0xff] %vm877_vm0, %v876_v30 }
 0x5be   : > { %1115 = shalt.err (!%p1112_p5)
}
 0x5bf   : > { %s1116_s17 = scalar_lea.hbm %s1443_s23, 128  ;;  %s1120_s14 = scalar_lea.hbm %s1503_s13, 256 }
 0x5c0   : > { %p1117_p6 = scmp.ne.s32.totalorder %s1443_s23, %s1116_s17  ;;  %p1121_p10 = scmp.lt.u32.totalorder %s1443_s23, %s1503_s13 }
 0x5c1   : > { %p1122_p11 = scmp.lt.u32.totalorder %s1120_s14, %s1116_s17  ;;  %p1124_p13 = scmp.lt.u32.totalorder %s1116_s17, %s1443_s23 }
 0x5c2   : > { %p1118_p7 = pnand %p1117_p6, %p1300_p4 }
 0x5c3   : > { %p1123_p12 = por %p1122_p11, %p1121_p10 }
 0x5c4   : > { %p1119_p9 = pneg %p1118_p7 }
 0x5c5   : > { %p1125_p0 = por %p1124_p13, %p1123_p12 }
 0x5c7   : > { %p1126_p1 = pnand %p1125_p0, %p1119_p9 }
 0x5c9   : > { %1129 = shalt.err (!%p1126_p1)
}
 0x5ca   : > { %1030 = dma.vmem_to_hbm [thread:$0]  (%p1300_p4), %s1445_s24, 128, %s1443_s23, %s880_s1  }
 0x5cb PF: > { %p1036_p2 = scmp.ge.s32.totalorder %s1180_s30, 2  ;;  %s906_s2 = sand.u32 1, %s1160_s25  }
 0x5cc   : > { %s907_s3 = scalar_lea.sflag [#allocation4], %s906_s2 }
 0x5cd   : > { %p1033_p3 = pnand %p1036_p2, %p1307_p8 }
 0x5cf   : > { %1155 = dma.done.wait (!%p1033_p3), %s907_s3, 128  }
 0x5d0   : > { %1157 = vsyncadd (!%p1033_p3), %s907_s3, 4294967168  ;;  %s26_s30 = sadd.s32 1, %s1180_s30   ;;  %s1518_s25 = smov %s1164_s26 }
 0x5d1   : > { %p23_p5 = scmp.ge.s32.totalorder %s26_s30, 4   ;;  %s1519_s26 = smov %s1168_s27 }
 0x5d2   : > { %s1520_s27 = smov %s1313_s21  ;;  %s1521_s28 = smov %s1176_s29 }
 0x5d3   : > { %s1522_s29 = smov %s1524_s16  ;;  %25 = sbr.rel (!%p23_p5) target bundleno = 9 (0x9), region = 107 }
 0x5da   :  { %912 = vsyncpa [#allocation4], 1 }
 0x5db   :  { %914 = vsyncpa [#allocation4 + $0x1], 1 }

</bundles_post_ra>
